<compile_context>
chip_gen: v6e
topology: v6e:2x2x1
jax: 0.10.0
libtpu: 0.0.40
codegen_flags: <defaults>
</compile_context>

<pallas_src>
from typing import NamedTuple

import jax
import jax.numpy as jnp
from jax import lax
from jax.experimental import pallas as pl
from jax.experimental.pallas import tpu as pltpu

_EPS = 1e-5


# --------------------------------------------------------------------------------------
# Helpers
# --------------------------------------------------------------------------------------
def _round_up(v, m):
    return ((v + m - 1) // m) * m


def _pick_tile(dim_padded, candidates=(512, 256, 128)):
    for t in candidates:
        if dim_padded % t == 0:
            return t
    return 128


def _vmem_limit_bytes():
    """Scoped-VMEM limit derived from physical capacity (leaves headroom for Mosaic)."""
    phys = 64 << 20  # conservative default (v7x per-TC size)
    try:
        phys = int(pltpu.get_tpu_info().vmem_capacity_bytes)
    except Exception:
        pass
    return max(32 << 20, min(phys - (16 << 20), 112 << 20))


def _single_path_vmem(n_pad, in_pad, out_pad, th):
    """Rough VMEM footprint of the single-out-tile path (double-buffered streams)."""
    bf16, f32 = 2, 4
    return (2 * n_pad * in_pad * bf16        # x block (grid-invariant, double-buffered)
            + 2 * in_pad * th * bf16         # W1 hidden tile
            + 2 * th * out_pad * bf16        # W2 tile
            + 2 * n_pad * out_pad * f32      # resident output block (accumulator)
            + 2 * n_pad * th * f32           # h / hr temporaries
            + 2 * (2 * th + out_pad) * f32)  # gamma, beta, b2


# --------------------------------------------------------------------------------------
# Kernels
# --------------------------------------------------------------------------------------
def _make_single_out_kernel(n_real):
    """grid = (hid_tiles,): hidden axis is the Linear2 K-reduction; single out tile.

    The output block is grid-invariant, so it stays resident in VMEM and is used as the
    f32 accumulator directly (no scratch, no finalize pass).
    """
    inv_n = 1.0 / float(n_real)

    def kernel(x_ref, w1_ref, gamma_ref, beta_ref, w2_ref, b2_ref, o_ref):
        j = pl.program_id(0)

        # ---- Linear1 for this hidden tile: bf16 operands on MXU, f32 accumulate. ----
        # Linear1's bias is omitted: training-mode BatchNorm centering cancels it.
        h = jnp.dot(x_ref[...], w1_ref[...], preferred_element_type=jnp.float32)

        # ---- BatchNorm1d (training-mode, biased variance) over the *real* batch. ----
        # Zero-padded batch rows contribute h == 0 to the sums, so dividing by n_real
        # gives the exact statistics.  Clamp var >= 0 (E[h^2]-E[h]^2 cancellation).
        mean = jnp.sum(h, axis=0, keepdims=True) * inv_n
        var = jnp.maximum(jnp.sum(h * h, axis=0, keepdims=True) * inv_n - mean * mean, 0.0)
        scale = gamma_ref[...] * lax.rsqrt(var + _EPS)               # folded affine scale
        hr = jnp.maximum((h - mean) * scale + beta_ref[...], 0.0)    # BN + ReLU

        # ---- Linear2 partial product; accumulate directly into the resident output. ----
        part = jnp.dot(hr.astype(w2_ref.dtype), w2_ref[...],
                       preferred_element_type=jnp.float32)

        @pl.when(j == 0)
        def _():
            o_ref[...] = part + b2_ref[...]       # fold b2 into the first write

        @pl.when(j > 0)
        def _():
            o_ref[...] += part

    return kernel


def _make_cached_kernel(n_real, th):
    """grid = (out_tiles, hid_tiles): post-ReLU activations are cached (bf16) in a
    persistent VMEM scratch on the first out tile and reused for the remaining out
    tiles, so Linear1+BN+ReLU is never recomputed."""
    inv_n = 1.0 / float(n_real)

    def kernel(x_ref, w1_ref, gamma_ref, beta_ref, w2_ref, b2_ref, o_ref, hr_ref):
        o = pl.program_id(0)
        j = pl.program_id(1)
        col = pl.multiple_of(j * th, th)          # lane-aligned offset into the hr cache

        @pl.when(o == 0)
        def _():
            h = jnp.dot(x_ref[...], w1_ref[...], preferred_element_type=jnp.float32)
            mean = jnp.sum(h, axis=0, keepdims=True) * inv_n
            var = jnp.maximum(jnp.sum(h * h, axis=0, keepdims=True) * inv_n - mean * mean,
                              0.0)
            scale = gamma_ref[...] * lax.rsqrt(var + _EPS)
            hr = jnp.maximum((h - mean) * scale + beta_ref[...], 0.0)
            hr_ref[:, pl.ds(col, th)] = hr.astype(hr_ref.dtype)

        part = jnp.dot(hr_ref[:, pl.ds(col, th)], w2_ref[...],
                       preferred_element_type=jnp.float32)

        @pl.when(j == 0)
        def _():
            o_ref[...] = part + b2_ref[...]

        @pl.when(j > 0)
        def _():
            o_ref[...] += part

    return kernel


# --------------------------------------------------------------------------------------
# Parameter preparation (one-time; hoisted out of the per-call wrapper)
# --------------------------------------------------------------------------------------
class MLPParams(NamedTuple):
    w1p: jax.Array   # (in_pad, hid_pad) bf16
    gp: jax.Array    # (1, hid_pad)      f32
    bp: jax.Array    # (1, hid_pad)      f32
    w2p: jax.Array   # (hid_pad, out_pad) bf16
    b2p: jax.Array   # (1, out_pad)      f32
    in_dim: int
    out_dim: int


def prepare_params(w1, b1, gamma, beta, w2, b2):
    """Pad + cast the static parameters once.  `b1` is accepted for parity with the
    PyTorch module but dropped: training-mode BN centering cancels it exactly."""
    del b1
    in_dim, hidden = w1.shape
    out_dim = w2.shape[1]
    in_pad = _round_up(in_dim, 128)
    hid_pad = _round_up(hidden, 128)
    out_pad = _round_up(out_dim, 128)

    w1p = jnp.pad(w1.astype(jnp.bfloat16), ((0, in_pad - in_dim), (0, hid_pad - hidden)))
    w2p = jnp.pad(w2.astype(jnp.bfloat16), ((0, hid_pad - hidden), (0, out_pad - out_dim)))
    gp = jnp.pad(gamma.reshape(1, hidden).astype(jnp.float32),
                 ((0, 0), (0, hid_pad - hidden)))
    bp = jnp.pad(beta.reshape(1, hidden).astype(jnp.float32),
                 ((0, 0), (0, hid_pad - hidden)))
    b2p = jnp.pad(b2.reshape(1, out_dim).astype(jnp.float32),
                  ((0, 0), (0, out_pad - out_dim)))
    return MLPParams(w1p, gp, bp, w2p, b2p, in_dim, out_dim)


# --------------------------------------------------------------------------------------
# Forward
# --------------------------------------------------------------------------------------
def mlp_forward_prepared(x, p: MLPParams):
    n, in_dim = x.shape
    assert in_dim == p.in_dim
    in_pad, hid_pad = p.w1p.shape
    out_pad = p.w2p.shape[1]
    out_dim = p.out_dim

    n_pad = _round_up(n, 16)  # 16: bf16 packs two rows per 32-bit sublane
    xp = jnp.pad(x.astype(jnp.bfloat16), ((0, n_pad - n), (0, in_pad - in_dim)))

    vmem_limit = _vmem_limit_bytes()
    budget = int(0.7 * vmem_limit)

    flops = 2 * n_pad * in_pad * hid_pad + 2 * n_pad * hid_pad * out_pad
    transcendentals = hid_pad
    bytes_accessed = (xp.size * 2 + p.w1p.size * 2 + p.w2p.size * 2
                      + (p.gp.size + p.bp.size + p.b2p.size) * 4
                      + n_pad * out_pad * 4)

    # Prefer a single out tile (no recompute, no hr cache) whenever it fits VMEM.
    th_single = None
    for t in (512, 256, 128):
        if hid_pad % t == 0 and _single_path_vmem(n_pad, in_pad, out_pad, t) <= budget:
            th_single = t
            break

    if th_single is not None:
        th = th_single
        out = pl.pallas_call(
            _make_single_out_kernel(n),
            out_shape=jax.ShapeDtypeStruct((n_pad, out_pad), jnp.float32),
            grid_spec=pltpu.PrefetchScalarGridSpec(
                num_scalar_prefetch=0,
                grid=(hid_pad // th,),
                in_specs=[
                    pl.BlockSpec((n_pad, in_pad), lambda j: (0, 0)),  # x (resident)
                    pl.BlockSpec((in_pad, th), lambda j: (0, j)),     # W1 hidden tile
                    pl.BlockSpec((1, th), lambda j: (0, j)),          # gamma tile
                    pl.BlockSpec((1, th), lambda j: (0, j)),          # beta tile
                    pl.BlockSpec((th, out_pad), lambda j: (j, 0)),    # W2 (K x N)
                    pl.BlockSpec((1, out_pad), lambda j: (0, 0)),     # b2
                ],
                out_specs=pl.BlockSpec((n_pad, out_pad), lambda j: (0, 0)),
            ),
            compiler_params=pltpu.CompilerParams(
                dimension_semantics=("arbitrary",),
                vmem_limit_bytes=vmem_limit,
            ),
            cost_estimate=pl.CostEstimate(
                flops=flops, transcendentals=transcendentals,
                bytes_accessed=bytes_accessed),
        )(xp, p.w1p, p.gp, p.bp, p.w2p, p.b2p)
    else:
        # Fallback for large out_pad: tile the out axis and cache hr across out tiles.
        th = _pick_tile(hid_pad)
        to = _pick_tile(out_pad)
        # TODO(synk): for very large batch/in_dim where even this exceeds VMEM, tile the
        # batch with a two-pass BatchNorm instead of keeping the batch fully resident.
        out = pl.pallas_call(
            _make_cached_kernel(n, th),
            out_shape=jax.ShapeDtypeStruct((n_pad, out_pad), jnp.float32),
            grid_spec=pltpu.PrefetchScalarGridSpec(
                num_scalar_prefetch=0,
                grid=(out_pad // to, hid_pad // th),
                in_specs=[
                    pl.BlockSpec((n_pad, in_pad), lambda o, j: (0, 0)),
                    pl.BlockSpec((in_pad, th), lambda o, j: (0, j)),
                    pl.BlockSpec((1, th), lambda o, j: (0, j)),
                    pl.BlockSpec((1, th), lambda o, j: (0, j)),
                    pl.BlockSpec((th, to), lambda o, j: (j, o)),
                    pl.BlockSpec((1, to), lambda o, j: (0, o)),
                ],
                out_specs=pl.BlockSpec((n_pad, to), lambda o, j: (0, o)),
                scratch_shapes=[pltpu.VMEM((n_pad, hid_pad), jnp.bfloat16)],  # hr cache
            ),
            compiler_params=pltpu.CompilerParams(
                # NOTE: the out axis must stay "arbitrary": the hr cache is filled only
                # at o == 0, so sharding it across TensorCores would be incorrect.
                dimension_semantics=("arbitrary", "arbitrary"),
                vmem_limit_bytes=vmem_limit,
            ),
            cost_estimate=pl.CostEstimate(
                flops=flops, transcendentals=transcendentals,
                bytes_accessed=bytes_accessed + (out_pad // to - 1) * p.w1p.size * 2),
        )(xp, p.w1p, p.gp, p.bp, p.w2p, p.b2p)

    return out[:n, :out_dim]


def mlp_forward(x, w1, b1, gamma, beta, w2, b2):
    """Convenience wrapper: one-shot prepare + forward."""
    return mlp_forward_prepared(x, prepare_params(w1, b1, gamma, beta, w2, b2))


# --------------------------------------------------------------------------------------
# References
# --------------------------------------------------------------------------------------
def reference_forward_f32(x, w1, b1, gamma, beta, w2, b2):
    """Pure-f32 semantic reference (exact PyTorch training-mode BN)."""
    h = x @ w1 + b1
    mean = jnp.mean(h, axis=0, keepdims=True)
    var = jnp.mean((h - mean) ** 2, axis=0, keepdims=True)
    h = (h - mean) * lax.rsqrt(var + _EPS) * gamma + beta
    h = jnp.maximum(h, 0.0)
    return h @ w2 + b2


def reference_forward_bf16_matched(x, w1, b1, gamma, beta, w2, b2):
    """Same math with the kernel's bf16 MXU-operand rounding, for a tight check."""
    h = jnp.dot(x.astype(jnp.bfloat16), w1.astype(jnp.bfloat16),
                preferred_element_type=jnp.float32) + b1
    mean = jnp.mean(h, axis=0, keepdims=True)
    var = jnp.maximum(jnp.mean(h * h, axis=0, keepdims=True) - mean * mean, 0.0)
    h = (h - mean) * (gamma * lax.rsqrt(var + _EPS)) + beta
    h = jnp.maximum(h, 0.0)
    return jnp.dot(h.astype(jnp.bfloat16), w2.astype(jnp.bfloat16),
                   preferred_element_type=jnp.float32) + b2


if __name__ == "__main__":
    # Batch >= 128 to fill MXU rows; feature dims stay small and are padded to
    # lane-dense 128 once, inside prepare_params / the wrapper.
    N, in_dim, out_dim = 128, 16, 8
    hidden = 2 * in_dim  # 32

    key = jax.random.PRNGKey(0)
    kx, kw1, kb1, kw2, kb2 = jax.random.split(key, 5)

    x = jax.random.normal(kx, (N, in_dim), dtype=jnp.float32)

    # PyTorch-style uniform init bounds (deterministic, synthetic).
    bound1 = 1.0 / (in_dim ** 0.5)
    w1 = jax.random.uniform(kw1, (in_dim, hidden), jnp.float32, -bound1, bound1)
    b1 = jax.random.uniform(kb1, (1, hidden), jnp.float32, -bound1, bound1)

    # BatchNorm1d affine params: weight=1, bias=0 (PyTorch defaults).
    gamma = jnp.ones((1, hidden), jnp.float32)
    beta = jnp.zeros((1, hidden), jnp.float32)

    bound2 = 1.0 / (hidden ** 0.5)
    w2 = jax.random.uniform(kw2, (hidden, out_dim), jnp.float32, -bound2, bound2)
    b2 = jax.random.uniform(kb2, (1, out_dim), jnp.float32, -bound2, bound2)

    # One-time parameter padding/cast (hoisted out of the per-call path).
    params = prepare_params(w1, b1, gamma, beta, w2, b2)

    out = jax.block_until_ready(mlp_forward_prepared(x, params))
    assert out.shape == (N, out_dim)

    ref_tight = reference_forward_bf16_matched(x, w1, b1, gamma, beta, w2, b2)
    ref_f32 = reference_forward_f32(x, w1, b1, gamma, beta, w2, b2)
    assert jnp.allclose(out, ref_tight, atol=2e-3, rtol=2e-3), \
        f"max|diff| vs bf16-matched ref = {float(jnp.max(jnp.abs(out - ref_tight)))}"
    assert jnp.allclose(out, ref_f32, atol=3e-2, rtol=3e-2), \
        f"max|diff| vs f32 ref = {float(jnp.max(jnp.abs(out - ref_f32)))}"

    print("KERNEL_OK")
</pallas_src>

<mosaic_0001>
module attributes {stable_mosaic.version = 11 : i64} {
  func.func @kernel(%arg0: i32, %arg1: memref<128x128xbf16, #tpu.memory_space<vmem>>, %arg2: memref<128x128xbf16, #tpu.memory_space<vmem>>, %arg3: memref<1x128xf32, #tpu.memory_space<vmem>>, %arg4: memref<1x128xf32, #tpu.memory_space<vmem>>, %arg5: memref<128x128xbf16, #tpu.memory_space<vmem>>, %arg6: memref<1x128xf32, #tpu.memory_space<vmem>>, %arg7: memref<128x128xf32, #tpu.memory_space<vmem>>) attributes {dimension_semantics = [#tpu.dimension_semantics<arbitrary>], iteration_bounds = array<i64: 1>, scalar_prefetch = 0 : i64, scratch_operands = 0 : i64, tpu.core_type = #tpu.core_type<tc>, window_params = [{pipeline_mode = #tpu.pipeline_mode<synchronous>, transform_indices = @transform_0, window_bounds = array<i64: 128, 128>}, {transform_indices = @transform_1, window_bounds = array<i64: 128, 128>}, {transform_indices = @transform_2, window_bounds = array<i64: 1, 128>}, {transform_indices = @transform_3, window_bounds = array<i64: 1, 128>}, {transform_indices = @transform_4, window_bounds = array<i64: 128, 128>}, {pipeline_mode = #tpu.pipeline_mode<synchronous>, transform_indices = @transform_5, window_bounds = array<i64: 1, 128>}, {pipeline_mode = #tpu.pipeline_mode<synchronous>, transform_indices = @transform_6, window_bounds = array<i64: 128, 128>}]} {
    %c0 = arith.constant 0 : index
    %c0_0 = arith.constant 0 : index
    %0 = vector.load %arg1[%c0, %c0_0] : memref<128x128xbf16, #tpu.memory_space<vmem>>, vector<128x128xbf16>
    %c0_1 = arith.constant 0 : index
    %c0_2 = arith.constant 0 : index
    %1 = vector.load %arg2[%c0_1, %c0_2] : memref<128x128xbf16, #tpu.memory_space<vmem>>, vector<128x128xbf16>
    %cst = arith.constant dense<0.000000e+00> : vector<128x128xf32>
    %2 = tpu.matmul %0, %1, %cst {dimension_numbers = #tpu.dot_dimension_numbers<[1], [0], [0], [1], [0, 0, 1, 1], [], []>} : vector<128x128xbf16>, vector<128x128xbf16>, vector<128x128xf32> -> vector<128x128xf32>
    %cst_3 = arith.constant dense<0.000000e+00> : vector<128xf32>
    %3 = vector.multi_reduction <add>, %2, %cst_3 [0] : vector<128x128xf32> to vector<128xf32>
    %4 = vector.shape_cast %3 : vector<128xf32> to vector<1x128xf32>
    %cst_4 = arith.constant 7.812500e-03 : f32
    %5 = vector.broadcast %cst_4 : f32 to vector<1x128xf32>
    %6 = arith.mulf %4, %5 : vector<1x128xf32>
    %7 = arith.mulf %2, %2 : vector<128x128xf32>
    %cst_5 = arith.constant dense<0.000000e+00> : vector<128xf32>
    %8 = vector.multi_reduction <add>, %7, %cst_5 [0] : vector<128x128xf32> to vector<128xf32>
    %9 = vector.shape_cast %8 : vector<128xf32> to vector<1x128xf32>
    %cst_6 = arith.constant 7.812500e-03 : f32
    %10 = vector.broadcast %cst_6 : f32 to vector<1x128xf32>
    %11 = arith.mulf %9, %10 : vector<1x128xf32>
    %12 = arith.mulf %6, %6 : vector<1x128xf32>
    %13 = arith.subf %11, %12 : vector<1x128xf32>
    %cst_7 = arith.constant 0.000000e+00 : f32
    %14 = vector.broadcast %cst_7 : f32 to vector<1x128xf32>
    %15 = arith.maximumf %13, %14 : vector<1x128xf32>
    %c0_8 = arith.constant 0 : index
    %c0_9 = arith.constant 0 : index
    %16 = vector.load %arg3[%c0_8, %c0_9] : memref<1x128xf32, #tpu.memory_space<vmem>>, vector<1x128xf32>
    %cst_10 = arith.constant 9.99999974E-6 : f32
    %17 = vector.broadcast %cst_10 : f32 to vector<1x128xf32>
    %18 = arith.addf %15, %17 : vector<1x128xf32>
    %19 = math.rsqrt %18 : vector<1x128xf32>
    %20 = arith.mulf %16, %19 : vector<1x128xf32>
    %21 = vector.broadcast %6 : vector<1x128xf32> to vector<128x128xf32>
    %22 = arith.subf %2, %21 : vector<128x128xf32>
    %23 = vector.broadcast %20 : vector<1x128xf32> to vector<128x128xf32>
    %24 = arith.mulf %22, %23 : vector<128x128xf32>
    %c0_11 = arith.constant 0 : index
    %c0_12 = arith.constant 0 : index
    %25 = vector.load %arg4[%c0_11, %c0_12] : memref<1x128xf32, #tpu.memory_space<vmem>>, vector<1x128xf32>
    %26 = vector.broadcast %25 : vector<1x128xf32> to vector<128x128xf32>
    %27 = arith.addf %24, %26 : vector<128x128xf32>
    %cst_13 = arith.constant 0.000000e+00 : f32
    %28 = vector.broadcast %cst_13 : f32 to vector<128x128xf32>
    %29 = arith.maximumf %27, %28 : vector<128x128xf32>
    %30 = arith.truncf %29 : vector<128x128xf32> to vector<128x128xbf16>
    %c0_14 = arith.constant 0 : index
    %c0_15 = arith.constant 0 : index
    %31 = vector.load %arg5[%c0_14, %c0_15] : memref<128x128xbf16, #tpu.memory_space<vmem>>, vector<128x128xbf16>
    %cst_16 = arith.constant dense<0.000000e+00> : vector<128x128xf32>
    %32 = tpu.matmul %30, %31, %cst_16 {dimension_numbers = #tpu.dot_dimension_numbers<[1], [0], [0], [1], [0, 0, 1, 1], [], []>} : vector<128x128xbf16>, vector<128x128xbf16>, vector<128x128xf32> -> vector<128x128xf32>
    %c0_i32 = arith.constant 0 : i32
    %33 = arith.cmpi eq, %arg0, %c0_i32 : i32
    %34 = arith.extui %33 : i1 to i32
    %c0_i32_17 = arith.constant 0 : i32
    %35 = arith.cmpi ne, %34, %c0_i32_17 : i32
    scf.if %35 {
      %c0_20 = arith.constant 0 : index
      %c0_21 = arith.constant 0 : index
      %39 = vector.load %arg6[%c0_20, %c0_21] : memref<1x128xf32, #tpu.memory_space<vmem>>, vector<1x128xf32>
      %40 = vector.broadcast %39 : vector<1x128xf32> to vector<128x128xf32>
      %41 = arith.addf %32, %40 : vector<128x128xf32>
      %c0_22 = arith.constant 0 : index
      %c0_23 = arith.constant 0 : index
      %42 = vector.load %arg7[%c0_22, %c0_23] : memref<128x128xf32, #tpu.memory_space<vmem>>, vector<128x128xf32>
      tpu.vector_store %arg7[%c0_22, %c0_23], %41 {strides = array<i32>} : memref<128x128xf32, #tpu.memory_space<vmem>>, vector<128x128xf32>,
    } else {
    }
    %c0_i32_18 = arith.constant 0 : i32
    %36 = arith.cmpi sgt, %arg0, %c0_i32_18 : i32
    %37 = arith.extui %36 : i1 to i32
    %c0_i32_19 = arith.constant 0 : i32
    %38 = arith.cmpi ne, %37, %c0_i32_19 : i32
    scf.if %38 {
      %c0_20 = arith.constant 0 : index
      %c0_21 = arith.constant 0 : index
      %39 = vector.load %arg7[%c0_20, %c0_21] : memref<128x128xf32, #tpu.memory_space<vmem>>, vector<128x128xf32>
      %40 = arith.addf %39, %32 : vector<128x128xf32>
      %c0_22 = arith.constant 0 : index
      %c0_23 = arith.constant 0 : index
      %41 = vector.load %arg7[%c0_22, %c0_23] : memref<128x128xf32, #tpu.memory_space<vmem>>, vector<128x128xf32>
      tpu.vector_store %arg7[%c0_22, %c0_23], %40 {strides = array<i32>} : memref<128x128xf32, #tpu.memory_space<vmem>>, vector<128x128xf32>,
    } else {
    }
    return
  }
  func.func @transform_0(%arg0: i32) -> (i32, i32) {
    %c0_i32 = arith.constant 0 : i32
    %c0_i32_0 = arith.constant 0 : i32
    %c0_i32_1 = arith.constant 0 : i32
    return %c0_i32, %c0_i32_0 : i32, i32
  }
  func.func @transform_1(%arg0: i32) -> (i32, i32) {
    %c0_i32 = arith.constant 0 : i32
    %c0_i32_0 = arith.constant 0 : i32
    return %c0_i32, %arg0 : i32, i32
  }
  func.func @transform_2(%arg0: i32) -> (i32, i32) {
    %c0_i32 = arith.constant 0 : i32
    %c0_i32_0 = arith.constant 0 : i32
    return %c0_i32, %arg0 : i32, i32
  }
  func.func @transform_3(%arg0: i32) -> (i32, i32) {
    %c0_i32 = arith.constant 0 : i32
    %c0_i32_0 = arith.constant 0 : i32
    return %c0_i32, %arg0 : i32, i32
  }
  func.func @transform_4(%arg0: i32) -> (i32, i32) {
    %c0_i32 = arith.constant 0 : i32
    %c0_i32_0 = arith.constant 0 : i32
    return %arg0, %c0_i32 : i32, i32
  }
  func.func @transform_5(%arg0: i32) -> (i32, i32) {
    %c0_i32 = arith.constant 0 : i32
    %c0_i32_0 = arith.constant 0 : i32
    %c0_i32_1 = arith.constant 0 : i32
    return %c0_i32, %c0_i32_0 : i32, i32
  }
  func.func @transform_6(%arg0: i32) -> (i32, i32) {
    %c0_i32 = arith.constant 0 : i32
    %c0_i32_0 = arith.constant 0 : i32
    %c0_i32_1 = arith.constant 0 : i32
    return %c0_i32, %c0_i32_0 : i32, i32
  }
}

</mosaic_0001>

<bundles_post_ra>
// kernel: tpu_custom_call.1
= control target key start
LH: loop header
LB: loop body
LE: loop exit
PB: predicated region body
PF: predicated region fallthrough
CT: control target
= control target key end

     0   :  { %11 = vsyncpa [#allocation3], 0  ;;  %s1157_s0 = inlined_call_operand.hbm [shape: bf16[128,128], index: 0, kind: input, shape index: {}]   ;;  %s1158_s1 = inlined_call_operand.hbm [shape: bf16[128,128], index: 1, kind: input, shape index: {}]   ;;  %s1159_s2 = inlined_call_operand.vmem [shape: f32[1,128], index: 2, kind: input, shape index: {}]   ;;  %s1160_s3 = inlined_call_operand.vmem [shape: f32[1,128], index: 3, kind: input, shape index: {}]   ;;  %s1161_s4 = inlined_call_operand.hbm [shape: bf16[128,128], index: 4, kind: input, shape index: {}]   ;;  %s1162_s5 = inlined_call_operand.vmem [shape: f32[1,128], index: 5, kind: input, shape index: {}]   ;;  %s1163_s6 = inlined_call_operand.hbm [shape: f32[128,128], index: 6, kind: output, shape index: {}]  }
   0x1   :  { %12 = vsyncpa [#allocation6], 0 }
   0x2   :  { %13 = vsyncpa [#allocation4], 0  ;;  %s959_s21 = smov [#allocation5]   ;;  %s960_s23 = smov [#allocation2]  }
   0x3   :  { %s31_s22 = sshll.u32 %s959_s21, 4  ;;  %s19_s24 = sshll.u32 %s960_s23, 4  ;;  %s32_s22 = int_to_ptr.vmem [resolvable:$true] %s31_s22  ;;  %s20_s24 = int_to_ptr.vmem [resolvable:$true] %s19_s24 }
   0x4   :  { %s881_s25 = scalar_lea.vmem %s32_s22, 1024  ;;  %p886_p1 = scmp.lt.s32.totalorder %s32_s22, %s32_s22 }
   0x5   :  { %p882_p0 = scmp.ne.s32.totalorder %s32_s22, %s881_s25  ;;  %p887_p2 = scmp.lt.s32.totalorder %s881_s25, %s881_s25 }
   0x7   :  { %p888_p3 = por %p887_p2, %p886_p1 }
   0x9   :  { %p889_p4 = pnand %p888_p3, %p882_p0 }
   0xb   :  { %892 = shalt.err (!%p889_p4)
}
   0xc   :  { %s961_s26 = smov 64   ;;  %s962_s27 = smov 4  }
   0xd   :  { %37 = dma.hbm_to_vmem [thread:$0]  %s1158_s1, 1024, %s32_s22, [#allocation6], %s961_s26, %s961_s26, %s962_s27  }
   0xe   :  { %s901_s30 = scalar_lea.vmem %s20_s24, 1024  ;;  %p906_p6 = scmp.lt.s32.totalorder %s20_s24, %s20_s24 }
   0xf   :  { %p902_p5 = scmp.ne.s32.totalorder %s20_s24, %s901_s30  ;;  %p907_p7 = scmp.lt.s32.totalorder %s901_s30, %s901_s30 }
  0x11   :  { %p908_p8 = por %p907_p7, %p906_p6 }
  0x13   :  { %p909_p9 = pnand %p908_p8, %p902_p5 }
  0x15   :  { %912 = shalt.err (!%p909_p9)
}
  0x16   :  { %25 = dma.hbm_to_vmem [thread:$0]  %s1157_s0, 1024, %s20_s24, [#allocation3], %s961_s26, %s961_s26, %s962_s27  }
  0x17   :  { %s963_s9 = smov [#allocation7]  }
  0x18   :  { %s47_s10 = sshll.u32 %s963_s9, 4  ;;  %s48_s10 = int_to_ptr.vmem [resolvable:$true] %s47_s10 }
  0x19   :  { %s921_s11 = scalar_lea.vmem %s48_s10, 1024  ;;  %p926_p11 = scmp.lt.s32.totalorder %s48_s10, %s48_s10 }
  0x1a   :  { %p922_p10 = scmp.ne.s32.totalorder %s48_s10, %s921_s11  ;;  %p927_p12 = scmp.lt.s32.totalorder %s921_s11, %s921_s11 }
  0x1c   :  { %p928_p13 = por %p927_p12, %p926_p11 }
  0x1e   :  { %p929_p0 = pnand %p928_p13, %p922_p10 }
  0x20   :  { %932 = shalt.err (!%p929_p0)
}
  0x21   :  { %53 = dma.hbm_to_vmem [thread:$0]  %s1161_s4, 1024, %s48_s10, [#allocation6], %s961_s26, %s961_s26, %s962_s27  }
  0x22   :  { %953 = dma.done.wait [#allocation3], 1024  }
  0x23   :  { %954 = vsyncadd [#allocation3], 4294966272 }
  0x24   :  { %955 = dma.done.wait [#allocation6], 2048  }
  0x25   :  { %956 = vsyncadd [#allocation6], 4294965248  ;;  %v847_v0 = vld [vmem:[#allocation5 + $0x38] sm:$0xff]   ;;  %v848_v1 = vld [vmem:[#allocation5 + $0x30] sm:$0xff]  }
  0x26   :  { %775 = vmatprep.subr.bf16.mxu0 %v847_v0  ;;  %v849_v2 = vld [vmem:[#allocation5 + $0x28] sm:$0xff]   ;;  %v850_v3 = vld [vmem:[#allocation5 + $0x20] sm:$0xff]   ;;  %v851_v5 = vld [vmem:[#allocation5 + $0x18] sm:$0xff]  }
  0x27   :  { %776 = vmatpush3.bf16.msra.mxu0 %v847_v0  ;;  %v855_v4 = vld [vmem:[#allocation2] sm:$0xff]   ;;  %v852_v6 = vld [vmem:[#allocation5 + $0x10] sm:$0xff]   ;;  %v853_v7 = vld [vmem:[#allocation5 + $0x8] sm:$0xff]  }
  0x28   :  { %777 = vmatprep.subr.bf16.mxu0 %v848_v1  ;;  %791 = vmatprep.mubr.bf16.mxu0 %v855_v4  ;;  %v854_v8 = vld [vmem:[#allocation5] sm:$0xff]   ;;  %v856_v9 = vld [vmem:[#allocation2 + $0x8] sm:$0xff]   ;;  %v857_v10 = vld [vmem:[#allocation2 + $0x10] sm:$0xff]  }
  0x29   :  { %v858_v11 = vld [vmem:[#allocation2 + $0x18] sm:$0xff]   ;;  %v859_v12 = vld [vmem:[#allocation2 + $0x20] sm:$0xff]   ;;  %v860_v13 = vld [vmem:[#allocation2 + $0x28] sm:$0xff]  }
  0x2a   :  { %v861_v14 = vld [vmem:[#allocation2 + $0x30] sm:$0xff]   ;;  %v862_v15 = vld [vmem:[#allocation2 + $0x38] sm:$0xff]   ;;  %v865_v18 = vld [vmem:[#allocation7 + $0x28] sm:$0xff]  }
  0x2b   :  { %778 = vmatpush3.bf16.msra.mxu0 %v848_v1  ;;  %v863_v16 = vld [vmem:[#allocation7 + $0x38] sm:$0xff]   ;;  %v864_v17 = vld [vmem:[#allocation7 + $0x30] sm:$0xff]   ;;  %v866_v19 = vld [vmem:[#allocation7 + $0x20] sm:$0xff]  }
  0x2c   :  { %779 = vmatprep.subr.bf16.mxu0 %v849_v2  ;;  %807 = vmatprep.subr.bf16.mxu1 %v863_v16  ;;  %v867_v20 = vld [vmem:[#allocation7 + $0x18] sm:$0xff]   ;;  %v868_v21 = vld [vmem:[#allocation7 + $0x10] sm:$0xff]   ;;  %v869_v22 = vld [vmem:[#allocation7 + $0x8] sm:$0xff]  }
  0x2d   :  { %808 = vmatpush3.bf16.msra.mxu1 %v863_v16  ;;  %v870_v23 = vld [vmem:[#allocation7] sm:$0xff]  }
  0x2e   :  { %809 = vmatprep.subr.bf16.mxu1 %v864_v17 }
  0x2f   :  { %780 = vmatpush3.bf16.msra.mxu0 %v849_v2 }
  0x30   :  { %781 = vmatprep.subr.bf16.mxu0 %v850_v3 }
  0x31   :  { %810 = vmatpush3.bf16.msra.mxu1 %v864_v17 }
  0x32   :  { %811 = vmatprep.subr.bf16.mxu1 %v865_v18 }
  0x33   :  { %782 = vmatpush3.bf16.msra.mxu0 %v850_v3 }
  0x34   :  { %783 = vmatprep.subr.bf16.mxu0 %v851_v5 }
  0x35   :  { %812 = vmatpush3.bf16.msra.mxu1 %v865_v18 }
  0x36   :  { %813 = vmatprep.subr.bf16.mxu1 %v866_v19 }
  0x37   :  { %784 = vmatpush3.bf16.msra.mxu0 %v851_v5 }
  0x38   :  { %785 = vmatprep.subr.bf16.mxu0 %v852_v6 }
  0x39   :  { %814 = vmatpush3.bf16.msra.mxu1 %v866_v19 }
  0x3a   :  { %815 = vmatprep.subr.bf16.mxu1 %v867_v20 }
  0x3b   :  { %786 = vmatpush3.bf16.msra.mxu0 %v852_v6 }
  0x3c   :  { %787 = vmatprep.subr.bf16.mxu0 %v853_v7 }
  0x3d   :  { %816 = vmatpush3.bf16.msra.mxu1 %v867_v20 }
  0x3e   :  { %817 = vmatprep.subr.bf16.mxu1 %v868_v21 }
  0x3f   :  { %788 = vmatpush3.bf16.msra.mxu0 %v853_v7 }
  0x40   :  { %789 = vmatprep.subr.bf16.mxu0 %v854_v8 }
  0x41   :  { %818 = vmatpush3.bf16.msra.mxu1 %v868_v21 }
  0x42   :  { %819 = vmatprep.subr.bf16.mxu1 %v869_v22 }
  0x43   :  { %790 = vmatpush3.bf16.msra.mxu0 %v854_v8 }
  0x45   :  { %820 = vmatpush3.bf16.msra.mxu1 %v869_v22 }
  0x46   :  { %792 = vmatmul.mubr.bf16.vlgmr.msra.gmra.mxu0 %v856_v9  ;;  %821 = vmatprep.subr.bf16.mxu1 %v870_v23 }
  0x47   :  { %795 = vmatprep.mubr.bf16.mxu0 %v857_v10 }
  0x49   :  { %822 = vmatpush3.bf16.msra.mxu1 %v870_v23 }
  0x4e   :  { %796 = vmatmul.mubr.bf16.gmra.mxu0 %v858_v11 }
  0x4f   :  { %799 = vmatprep.mubr.bf16.mxu0 %v859_v12 }
  0x56   :  { %800 = vmatmul.mubr.bf16.gmra.mxu0 %v860_v13 }
  0x57   :  { %803 = vmatprep.mubr.bf16.mxu0 %v861_v14 }
  0x5e   :  { %804 = vmatmul.mubr.bf16.gmra.mxu0 %v862_v15 }
 0x106   :  { %v1011_v24 = vpop.f32.mrf.mxu0 }
 0x107   :  { %v315_v32 = vmul.f32 %v1011_v24, %v1011_v24 }
 0x108   :  { %v1013_v25 = vpop.f32.mrf.mxu0 }
 0x109   :  { %v313_v28 = vmul.f32 %v1013_v25, %v1013_v25 }
 0x10a   :  { %v1015_v26 = vpop.f32.mrf.mxu0 }
 0x10b   :  { %v316_v36 = vmul.f32 %v1015_v26, %v1015_v26 }
 0x10c   :  { %v1017_v27 = vpop.f32.mrf.mxu0 }
 0x10d   :  { %v291_v29 = vadd.f32 %v1017_v27, %v1013_v25  ;;  %v314_v30 = vmul.f32 %v1017_v27, %v1017_v27 }
 0x10e   :  { %v1025_v31 = vpop.f32.mrf.mxu0 }
 0x10f   :  { %v292_v33 = vadd.f32 %v1011_v24, %v291_v29  ;;  %v329_v34 = vadd.f32 %v314_v30, %v313_v28  ;;  %v319_v48 = vmul.f32 %v1025_v31, %v1025_v31 }
 0x110   :  { %v1030_v35 = vpop.f32.mrf.mxu0 }
 0x111   :  { %v330_v37 = vadd.f32 %v329_v34, %v315_v32  ;;  %v293_v38 = vadd.f32 %v1015_v26, %v292_v33  ;;  %v317_v41 = vmul.f32 %v1030_v35, %v1030_v35 }
 0x112   :  { %v1035_v39 = vpop.f32.mrf.mxu0 }
 0x113   :  { %v294_v40 = vadd.f32 %v293_v38, %v1030_v35  ;;  %v331_v42 = vadd.f32 %v330_v37, %v316_v36  ;;  %v320_v52 = vmul.f32 %v1035_v39, %v1035_v39 }
 0x114   :  { %v1040_v43 = vpop.f32.mrf.mxu0 }
 0x115   :  { %v332_v44 = vadd.f32 %v331_v42, %v317_v41  ;;  %v295_v45 = vadd.f32 %v294_v40, %v1040_v43  ;;  %v318_v46 = vmul.f32 %v1040_v43, %v1040_v43 }
 0x116   :  { %v1045_v47 = vpop.f32.mrf.mxu0 }
 0x117   :  { %v296_v49 = vadd.f32 %v1025_v31, %v295_v45  ;;  %v333_v50 = vadd.f32 %v332_v44, %v318_v46  ;;  %v323_v0 = vmul.f32 %v1045_v47, %v1045_v47 }
 0x118   :  { %v1050_v51 = vpop.f32.mrf.mxu0 }
 0x119   :  { %v334_v53 = vadd.f32 %v333_v50, %v319_v48  ;;  %v297_v54 = vadd.f32 %v1035_v39, %v296_v49  ;;  %v321_v57 = vmul.f32 %v1050_v51, %v1050_v51  ;;  %v375_v49 = vlaneseq }
 0x11a   :  { %v1055_v55 = vpop.f32.mrf.mxu0 }
 0x11b   :  { %v298_v56 = vadd.f32 %v297_v54, %v1050_v51  ;;  %v335_v58 = vadd.f32 %v334_v53, %v320_v52  ;;  %v324_v4 = vmul.f32 %v1055_v55, %v1055_v55  ;;  %v376_v50 = vshrl.u32 %v375_v49, 7  ;;  %v354_v52 = vld [vmem:[%s1159_s2] sm:$0x1] }
 0x11c   :  { %v1060_v59 = vpop.f32.mrf.mxu0 }
 0x11d   :  { %v336_v60 = vadd.f32 %v335_v58, %v321_v57  ;;  %v299_v61 = vadd.f32 %v298_v56, %v1060_v59  ;;  %v322_v62 = vmul.f32 %v1060_v59, %v1060_v59  ;;  %v377_v53 = vsub.s32 0, %v376_v50 }
 0x11e   :  { %v1065_v63 = vpop.f32.mrf.mxu0 }
 0x11f   :  { %v300_v1 = vadd.f32 %v1045_v47, %v299_v61  ;;  %v337_v2 = vadd.f32 %v336_v60, %v322_v62  ;;  %v327_v15 = vmul.f32 %v1065_v63, %v1065_v63 }
 0x120   :  { %v1070_v3 = vpop.f32.mrf.mxu0 }
 0x121   :  { %v338_v5 = vadd.f32 %v337_v2, %v323_v0  ;;  %v301_v6 = vadd.f32 %v1055_v55, %v300_v1  ;;  %v325_v9 = vmul.f32 %v1070_v3, %v1070_v3 }
 0x122   :  { %v1075_v7 = vpop.f32.mrf.mxu0 }
 0x123   :  { %v302_v8 = vadd.f32 %v301_v6, %v1070_v3  ;;  %v339_v10 = vadd.f32 %v338_v5, %v324_v4  ;;  %v328_v18 = vmul.f32 %v1075_v7, %v1075_v7 }
 0x124   :  { %v1080_v11 = vpop.f32.mrf.mxu0 }
 0x125   :  { %v340_v12 = vadd.f32 %v339_v10, %v325_v9  ;;  %v303_v13 = vadd.f32 %v302_v8, %v1080_v11  ;;  %v326_v14 = vmul.f32 %v1080_v11, %v1080_v11 }
 0x127   :  { %v304_v16 = vadd.f32 %v1065_v63, %v303_v13  ;;  %v341_v17 = vadd.f32 %v340_v12, %v326_v14 }
 0x129   :  { %v305_v19 = vadd.f32 %v1075_v7, %v304_v16  ;;  %v342_v20 = vadd.f32 %v341_v17, %v327_v15 }
 0x12b   :  { %v306_v21 = vrot.slane %v305_v19, 4  ;;  %v343_v22 = vadd.f32 %v342_v20, %v328_v18 }
 0x12d   :  { %v307_v23 = vadd.f32 %v306_v21, %v305_v19  ;;  %v344_v28 = vrot.slane %v343_v22, 4 }
 0x12f   :  { %v308_v29 = vrot.slane %v307_v23, 2  ;;  %v345_v30 = vadd.f32 %v344_v28, %v343_v22 }
 0x131   :  { %v309_v32 = vadd.f32 %v308_v29, %v307_v23  ;;  %v346_v33 = vrot.slane %v345_v30, 2 }
 0x133   :  { %v310_v34 = vrot.slane %v309_v32, 1  ;;  %v347_v36 = vadd.f32 %v346_v33, %v345_v30 }
 0x135   :  { %v311_v37 = vadd.f32 %v310_v34, %v309_v32  ;;  %v348_v38 = vrot.slane %v347_v36, 1 }
 0x137   :  { %v1091_v40 = vmul.f32 0.0078125, %v311_v37  ;;  %v349_v41 = vadd.f32 %v348_v38, %v347_v36 }
 0x139   :  { %v350_v42 = vmul.f32 0.0078125, %v349_v41  ;;  %v351_v44 = vmul.f32 %v1091_v40, %v1091_v40  ;;  %v371_v57 = vsub.f32 %v1080_v11, %v1091_v40  ;;  %v358_v58 = vsub.f32 %v1013_v25, %v1091_v40  ;;  %v1115_v25 = vld [vmem:[%s1160_s3] ss:$0 sm:$0xff] }
 0x13a   :  { %v359_v60 = vsub.f32 %v1017_v27, %v1091_v40  ;;  %v360_v61 = vsub.f32 %v1011_v24, %v1091_v40  ;;  %v361_v0 = vsub.f32 %v1015_v26, %v1091_v40  ;;  %v362_v1 = vsub.f32 %v1030_v35, %v1091_v40 }
 0x13b   :  { %v352_v45 = vsub.f32 %v350_v42, %v351_v44  ;;  %v363_v2 = vsub.f32 %v1040_v43, %v1091_v40  ;;  %v364_v27 = vsub.f32 %v1025_v31, %v1091_v40  ;;  %v365_v24 = vsub.f32 %v1035_v39, %v1091_v40 }
 0x13c   :  { %v366_v26 = vsub.f32 %v1050_v51, %v1091_v40  ;;  %v367_v35 = vsub.f32 %v1060_v59, %v1091_v40  ;;  %v368_v6 = vsub.f32 %v1045_v47, %v1091_v40  ;;  %v369_v51 = vsub.f32 %v1055_v55, %v1091_v40 }
 0x13d   :  { %v353_v46 = vmax.f32 %v352_v45, 0.0  ;;  %v372_v34 = vsub.f32 %v1065_v63, %v1091_v40  ;;  %v373_v45 = vsub.f32 %v1075_v7, %v1091_v40  ;;  %v370_v63 = vsub.f32 %v1070_v3, %v1091_v40 }
 0x13f   :  { %v355_v48 = vadd.f32 1e-05, %v353_v46 }
 0x141   :  { %871 = vrsqrt.f32 %v355_v48 }
 0x14e   :  { %v872_v54 = vpop.eup %871 }
 0x14f   :  { %v357_v56 = vmul.f32 %v872_v54, %v354_v52 }
 0x151   :  { %v378_v62 = vrot.slane %v357_v56, %v377_v53 }
 0x153   :  { %v380_v4 = vmul.f32 %v378_v62, %v358_v58  ;;  %v381_v5 = vmul.f32 %v378_v62, %v359_v60  ;;  %v382_v43 = vmul.f32 %v378_v62, %v360_v61  ;;  %v383_v8 = vmul.f32 %v378_v62, %v361_v0 }
 0x154   :  { %v384_v9 = vmul.f32 %v378_v62, %v362_v1  ;;  %v385_v10 = vmul.f32 %v378_v62, %v363_v2  ;;  %v386_v11 = vmul.f32 %v378_v62, %v364_v27  ;;  %v387_v47 = vmul.f32 %v378_v62, %v365_v24 }
 0x155   :  { %v403_v31 = vadd.f32 %v1115_v25, %v380_v4  ;;  %v404_v39 = vadd.f32 %v1115_v25, %v381_v5  ;;  %v405_v12 = vadd.f32 %v1115_v25, %v382_v43  ;;  %v406_v59 = vadd.f32 %v1115_v25, %v383_v8 }
 0x156   :  { %v407_v13 = vadd.f32 %v1115_v25, %v384_v9  ;;  %v408_v14 = vadd.f32 %v1115_v25, %v385_v10  ;;  %v409_v18 = vadd.f32 %v1115_v25, %v386_v11  ;;  %v410_v22 = vadd.f32 %v1115_v25, %v387_v47 }
 0x157   :  { %v419_v15 = vmax.f32 %v403_v31, 0.0  ;;  %v420_v16 = vmax.f32 %v404_v39, 0.0  ;;  %v421_v17 = vmax.f32 %v405_v12, 0.0  ;;  %v422_v19 = vmax.f32 %v406_v59, 0.0 }
 0x158   :  { %v423_v20 = vmax.f32 %v407_v13, 0.0  ;;  %v424_v21 = vmax.f32 %v408_v14, 0.0  ;;  %v425_v28 = vmax.f32 %v409_v18, 0.0  ;;  %v388_v55 = vmul.f32 %v378_v62, %v366_v26 }
 0x159   :  { %v435_v23 = vpack.c.bf16 %v420_v16, %v419_v15  ;;  %v389_v29 = vmul.f32 %v378_v62, %v367_v35  ;;  %v436_v30 = vpack.c.bf16 %v422_v19, %v421_v17  ;;  %v426_v32 = vmax.f32 %v410_v22, 0.0 }
 0x15a   :  { %v390_v33 = vmul.f32 %v378_v62, %v368_v6  ;;  %v437_v36 = vpack.c.bf16 %v424_v21, %v423_v20  ;;  %v411_v37 = vadd.f32 %v1115_v25, %v388_v55  ;;  %v391_v41 = vmul.f32 %v378_v62, %v369_v51 }
 0x15b   :  { %823 = vmatprep.mubr.bf16.mxu1 %v435_v23  ;;  %v412_v38 = vadd.f32 %v1115_v25, %v389_v29  ;;  %v438_v42 = vpack.c.bf16 %v426_v32, %v425_v28  ;;  %v394_v46 = vmul.f32 %v378_v62, %v372_v34  ;;  %v393_v49 = vmul.f32 %v378_v62, %v371_v57 }
 0x15c   :  { %824 = vmatmul.mubr.bf16.vlgmr.msra.gmra.mxu1 %v436_v30  ;;  %v413_v44 = vadd.f32 %v1115_v25, %v390_v33  ;;  %v414_v48 = vadd.f32 %v1115_v25, %v391_v41  ;;  %v395_v52 = vmul.f32 %v378_v62, %v373_v45  ;;  %v427_v54 = vmax.f32 %v411_v37, 0.0 }
 0x15d   :  { %827 = vmatprep.mubr.bf16.mxu1 %v437_v36  ;;  %v417_v53 = vadd.f32 %v1115_v25, %v394_v46  ;;  %v428_v56 = vmax.f32 %v412_v38, 0.0  ;;  %v392_v60 = vmul.f32 %v378_v62, %v370_v63  ;;  %v416_v2 = vadd.f32 %v1115_v25, %v393_v49  ;;  %v742_v62 = vld [vmem:[%s1162_s5] ss:$0 sm:$0xff]  ;;  %s964_s5 = smov [#allocation8]  }
 0x15e   :  { %v429_v50 = vmax.f32 %v413_v44, 0.0  ;;  %v430_v58 = vmax.f32 %v414_v48, 0.0  ;;  %v418_v61 = vadd.f32 %v1115_v25, %v395_v52  ;;  %s704_s15 = sshll.u32 %s964_s5, 4  ;;  %s705_s15 = int_to_ptr.vmem [resolvable:$true] %s704_s15 }
 0x15f   :  { %v433_v0 = vmax.f32 %v417_v53, 0.0  ;;  %v439_v27 = vpack.c.bf16 %v428_v56, %v427_v54  ;;  %v415_v24 = vadd.f32 %v1115_v25, %v392_v60  ;;  %v432_v57 = vmax.f32 %v416_v2, 0.0  ;;  %s933_s16 = scalar_lea.vmem %s705_s15, 2048  ;;  %p938_p2 = scmp.lt.s32.totalorder %s705_s15, %s705_s15 }
 0x160   :  { %v440_v7 = vpack.c.bf16 %v430_v58, %v429_v50  ;;  %v434_v1 = vmax.f32 %v418_v61, 0.0  ;;  %p934_p1 = scmp.ne.s32.totalorder %s705_s15, %s933_s16  ;;  %p939_p3 = scmp.lt.s32.totalorder %s933_s16, %s933_s16 }
 0x161   :  { %v431_v40 = vmax.f32 %v415_v24, 0.0 }
 0x162   :  { %v442_v3 = vpack.c.bf16 %v434_v1, %v433_v0  ;;  %p940_p4 = por %p939_p3, %p938_p2 }
 0x163   :  { %v441_v26 = vpack.c.bf16 %v432_v57, %v431_v40 }
 0x164   :  { %828 = vmatmul.mubr.bf16.gmra.mxu1 %v438_v42  ;;  %p941_p5 = pnand %p940_p4, %p934_p1 }
 0x165   :  { %831 = vmatprep.mubr.bf16.mxu1 %v439_v27 }
 0x16c   :  { %832 = vmatmul.mubr.bf16.gmra.mxu1 %v440_v7 }
 0x16d   :  { %835 = vmatprep.mubr.bf16.mxu1 %v441_v26 }
 0x174   :  { %836 = vmatmul.mubr.bf16.gmra.mxu1 %v442_v3 }
 0x21c   :  { %v825_v35 = vpop.f32.mrf.mxu1 }
 0x21d   :  { %v617_v4 = vadd.f32 %v825_v35, %v742_v62 }
 0x21e   :  { %v541_v5 = vpop.f32.mrf.mxu1 }
 0x21f   :  { %633 = vst [vmem:[#allocation8 + $0x10] sm:$0xff] %v617_v4  ;;  %v615_v43 = vadd.f32 %v742_v62, %v541_v5 }
 0x220   :  { %v826_v6 = vpop.f32.mrf.mxu1 }
 0x221   :  { %631 = vst [vmem:[#allocation8] sm:$0xff] %v615_v43  ;;  %v618_v25 = vadd.f32 %v826_v6, %v742_v62 }
 0x222   :  { %v544_v8 = vpop.f32.mrf.mxu1 }
 0x223   :  { %634 = vst [vmem:[#allocation8 + $0x18] sm:$0xff] %v618_v25  ;;  %v616_v9 = vadd.f32 %v742_v62, %v544_v8 }
 0x224   :  { %v829_v10 = vpop.f32.mrf.mxu1 }
 0x225   :  { %632 = vst [vmem:[#allocation8 + $0x8] sm:$0xff] %v616_v9  ;;  %v621_v11 = vadd.f32 %v829_v10, %v742_v62 }
 0x226   :  { %v557_v31 = vpop.f32.mrf.mxu1 }
 0x227   :  { %637 = vst [vmem:[#allocation8 + $0x30] sm:$0xff] %v621_v11  ;;  %v619_v39 = vadd.f32 %v742_v62, %v557_v31 }
 0x228   :  { %v830_v12 = vpop.f32.mrf.mxu1 }
 0x229   :  { %635 = vst [vmem:[#allocation8 + $0x20] sm:$0xff] %v619_v39  ;;  %v622_v51 = vadd.f32 %v830_v12, %v742_v62 }
 0x22a   :  { %v560_v59 = vpop.f32.mrf.mxu1 }
 0x22b   :  { %638 = vst [vmem:[#allocation8 + $0x38] sm:$0xff] %v622_v51  ;;  %v620_v13 = vadd.f32 %v742_v62, %v560_v59 }
 0x22c   :  { %v833_v14 = vpop.f32.mrf.mxu1 }
 0x22d   :  { %636 = vst [vmem:[#allocation8 + $0x28] sm:$0xff] %v620_v13  ;;  %v625_v47 = vadd.f32 %v833_v14, %v742_v62 }
 0x22e   :  { %v573_v15 = vpop.f32.mrf.mxu1 }
 0x22f   :  { %641 = vst [vmem:[#allocation8 + $0x50] sm:$0xff] %v625_v47  ;;  %v623_v16 = vadd.f32 %v742_v62, %v573_v15 }
 0x230   :  { %v834_v17 = vpop.f32.mrf.mxu1 }
 0x231   :  { %639 = vst [vmem:[#allocation8 + $0x40] sm:$0xff] %v623_v16  ;;  %v626_v18 = vadd.f32 %v834_v17, %v742_v62 }
 0x232   :  { %v576_v19 = vpop.f32.mrf.mxu1 }
 0x233   :  { %642 = vst [vmem:[#allocation8 + $0x58] sm:$0xff] %v626_v18  ;;  %v624_v20 = vadd.f32 %v742_v62, %v576_v19 }
 0x234   :  { %v837_v21 = vpop.f32.mrf.mxu1 }
 0x235   :  { %640 = vst [vmem:[#allocation8 + $0x48] sm:$0xff] %v624_v20  ;;  %v629_v22 = vadd.f32 %v837_v21, %v742_v62 }
 0x236   :  { %v589_v23 = vpop.f32.mrf.mxu1 }
 0x237   :  { %645 = vst [vmem:[#allocation8 + $0x70] sm:$0xff] %v629_v22  ;;  %v627_v28 = vadd.f32 %v742_v62, %v589_v23 }
 0x238   :  { %v838_v55 = vpop.f32.mrf.mxu1 }
 0x239   :  { %643 = vst [vmem:[#allocation8 + $0x60] sm:$0xff] %v627_v28  ;;  %v630_v29 = vadd.f32 %v838_v55, %v742_v62 }
 0x23a   :  { %v592_v30 = vpop.f32.mrf.mxu1 }
 0x23b   :  { %646 = vst [vmem:[#allocation8 + $0x78] sm:$0xff] %v630_v29  ;;  %v628_v32 = vadd.f32 %v742_v62, %v592_v30 }
 0x23d   :  { %644 = vst [vmem:[#allocation8 + $0x68] sm:$0xff] %v628_v32 }
 0x23e   :  { %944 = shalt.err (!%p941_p5)
}
 0x23f   :  { %s965_s17 = smov 128   ;;  %s966_s18 = smov 8  }
 0x240   :  { %710 = dma.vmem_to_hbm [thread:$0]  %s705_s15, 2048, %s1163_s6, [#allocation4], %s965_s17, %s965_s17, %s966_s18  }
 0x241   :  { %957 = dma.done.wait [#allocation4], 2048  }
 0x242   :  { %958 = vsyncadd [#allocation4], 4294965248 }
 0x243   :  { %714 = vsyncpa [#allocation3], 1 }
 0x244   :  { %715 = vsyncpa [#allocation6], 1 }
 0x245   :  { %716 = vsyncpa [#allocation4], 1 }

</bundles_post_ra>
